<compile_context>
chip_gen: v7x
topology: tpu7x:2x2x1
jax: 0.10.0
libtpu: 0.0.40
codegen_flags: <defaults>
</compile_context>

<pallas_src>
from functools import partial

import numpy as np
import jax
import jax.numpy as jnp
from jax.experimental import pallas as pl
from jax.experimental.pallas import tpu as pltpu

EPS = 1e-5
PRELU_A = 0.25                      # nn.PReLU() default init (shared parameter)


def _prelu(x):
    return jnp.where(x >= 0.0, x, PRELU_A * x)


# ---------------------------------------------------------------------------
# VMEM / tile helpers
# ---------------------------------------------------------------------------
def _vmem_limit(block_bytes):
    """Scoped-VMEM limit: block bytes + margin, clamped to ~75% of physical."""
    try:
        cap = int(pltpu.get_tpu_info().vmem_capacity_bytes) * 3 // 4
    except Exception:                       # pragma: no cover - non-TPU fallback
        cap = 48 * 1024 * 1024              # safe on v7x (64 MiB physical)
    need = int(block_bytes) + (8 << 20)     # live-value / pipelining margin
    return int(min(max(need, 32 << 20), max(cap, 16 << 20)))


def _pick_spatial_tile(hw, bytes_per_col, budget=24 << 20):
    """Stage-1 lane-axis tile: full HW if it fits, else the largest
    multiple-of-128 divisor of HW whose double-buffered block fits budget."""
    if hw % 128 != 0 or 2 * hw * bytes_per_col <= budget:
        return hw
    ts = max(128, (budget // (2 * bytes_per_col)) // 128 * 128)
    ts = min(ts, hw)
    while hw % ts != 0:
        ts -= 128
    return ts


def _pick_c1_chunk(c1, hw, k, y1_esize, budget=24 << 20):
    """Stage-2 contraction chunk (lane axis of the weight block): must equal
    C1 or be a multiple of 128 dividing C1."""
    per_c = 2 * (hw * y1_esize + 9 * k * 4)
    if c1 % 128 != 0 or c1 * per_c <= budget:
        return c1
    tc = max(128, (budget // per_c) // 128 * 128)
    tc = min(tc, c1)
    while c1 % tc != 0:
        tc -= 128
    return tc


# ---------------------------------------------------------------------------
# Stage 1: (BN1-folded) 1x1 conv -> PReLU, channels-first.
# Block: (Cin, TS) spatial chunk of one batch item.  Also accumulates BN2
# statistics into a resident (C1, 2) output block per batch item.
# ---------------------------------------------------------------------------
def _stage1_kernel(x_ref, w_ref, b_ref, y_ref, st_ref):
    # x: (Cin, TS)  w: (C1, Cin)  b: (C1, 1)  y: (C1, TS)  st: (C1, 2)
    y = jnp.dot(w_ref[...], x_ref[...], preferred_element_type=jnp.float32)
    y = y + b_ref[...]                                   # bias, lane-broadcast
    y = _prelu(y)
    y_ref[...] = y.astype(y_ref.dtype)

    # Fused BN2 statistics, accumulated across the (arbitrary) spatial axis in
    # the resident output block -> exactly one tiny writeback per batch item.
    @pl.when(pl.program_id(1) == 0)
    def _():
        st_ref[...] = jnp.zeros_like(st_ref)

    st_ref[:, 0:1] += jnp.sum(y, axis=1, keepdims=True)          # sum
    st_ref[:, 1:2] += jnp.sum(y * y, axis=1, keepdims=True)      # sum of sq


# ---------------------------------------------------------------------------
# Stage 2: 3x3 conv (padding=1) with BN2 scale folded into the weights and
# (BN2 shift + bias) as a precomputed border-aware additive correction.
# One combined (9K, TC)@(TC, HW) matmul per (batch, C1-chunk) grid step, then
# 9 lane-rolls + masks accumulate the taps into the resident output block.
# ---------------------------------------------------------------------------
def _stage2_kernel(width, y_ref, w_ref, cb_ref, m_ref, o_ref):
    # y: (TC, HW)  w: (9K, TC)  cb: (K, HW)  m: (9, HW)  o: (K, HW)
    c = pl.program_id(1)

    @pl.when(c == 0)
    def _():
        o_ref[...] = cb_ref[...]            # corr(shift2, borders) + conv bias

    K = o_ref.shape[0]
    HW = o_ref.shape[1]

    p = jnp.dot(w_ref[...], y_ref[...].astype(jnp.float32),
                preferred_element_type=jnp.float32)               # (9K, HW)

    acc = o_ref[...]
    for t in range(9):
        ddy, ddx = t // 3 - 1, t % 3 - 1
        s = ddy * width + ddx               # flat spatial offset of this tap
        pt = p[t * K:(t + 1) * K, :]
        if s != 0:
            # out[i] needs p_t[i + s]  ->  roll by -s (XLU slot, cheap).
            pt = pltpu.roll(pt, shift=(-s) % HW, axis=1)
        acc = acc + pt * m_ref[t:t + 1, :]  # zero the wrapped border lanes
    o_ref[...] = acc

    @pl.when(c == pl.num_programs(1) - 1)
    def _():
        o_ref[...] = _prelu(o_ref[...])


# ---------------------------------------------------------------------------
# Wrapper
# ---------------------------------------------------------------------------
def bottleneck_forward(x_nchw, params, *, y1_dtype=jnp.float32):
    g1, be1, w1, b1, g2, be2, w2, b2 = params
    N, Cin, H, W = x_nchw.shape
    C1 = w1.shape[1]            # 4*k
    K = w2.shape[-1]            # k
    HW = H * W
    y1_esize = jnp.dtype(y1_dtype).itemsize

    # --- BatchNorm #1 (training-mode batch stats) folded into the 1x1 conv ---
    mu1 = jnp.mean(x_nchw, axis=(0, 2, 3))
    var1 = jnp.var(x_nchw, axis=(0, 2, 3))
    scale1 = g1 / jnp.sqrt(var1 + EPS)
    shift1 = be1 - mu1 * scale1
    w1f = (w1 * scale1[:, None]).T            # (C1, Cin)
    b1f = (shift1 @ w1 + b1)[:, None]         # (C1, 1)

    # Channels-first, spatial flattened onto lanes.
    x_flat = x_nchw.reshape(N, Cin, HW)

    TS = _pick_spatial_tile(HW, (Cin * 4 + C1 * y1_esize))
    Mc = HW // TS

    vmem1 = _vmem_limit(2 * (Cin * TS * 4 + C1 * TS * y1_esize
                             + C1 * Cin * 4 + C1 * 4 + C1 * 2 * 4))

    y1, stats = pl.pallas_call(
        _stage1_kernel,
        out_shape=(
            jax.ShapeDtypeStruct((N, C1, HW), y1_dtype),
            jax.ShapeDtypeStruct((N, C1, 2), jnp.float32),
        ),
        grid_spec=pltpu.PrefetchScalarGridSpec(
            num_scalar_prefetch=0,
            grid=(N, Mc),
            in_specs=[
                pl.BlockSpec((pl.Squeezed(), Cin, TS), lambda n, m: (n, 0, m)),
                pl.BlockSpec((C1, Cin), lambda n, m: (0, 0)),
                pl.BlockSpec((C1, 1), lambda n, m: (0, 0)),
            ],
            out_specs=[
                pl.BlockSpec((pl.Squeezed(), C1, TS), lambda n, m: (n, 0, m)),
                pl.BlockSpec((pl.Squeezed(), C1, 2), lambda n, m: (n, 0, 0)),
            ],
        ),
        compiler_params=pltpu.CompilerParams(
            dimension_semantics=("parallel", "arbitrary"),
            vmem_limit_bytes=vmem1),
    )(x_flat, w1f, b1f)

    # --- BatchNorm #2 from the fused per-batch statistics (no y1 re-read) ---
    cnt = float(N * HW)
    ssum = jnp.sum(stats[:, :, 0], axis=0)
    ssq = jnp.sum(stats[:, :, 1], axis=0)
    mu2 = ssum / cnt
    var2 = jnp.maximum(ssq / cnt - mu2 * mu2, 0.0)    # biased var (train mode)
    scale2 = g2 / jnp.sqrt(var2 + EPS)
    shift2 = be2 - mu2 * scale2

    # Fold BN2 scale into the 3x3 weights (exact under zero padding).
    # w2: (3, 3, C1, K)  ->  w2f: (9K, C1), tap-major (dy, dx), out-ch inner.
    w2f = jnp.einsum('ijck,c->ijkc', w2, scale2).reshape(9 * K, C1)

    # Border-validity masks per tap, flattened over HW (0/1 f32).
    yy = jnp.arange(H)
    xx = jnp.arange(W)
    mask_rows = []
    for ddy in (-1, 0, 1):
        my = ((yy + ddy >= 0) & (yy + ddy < H)).astype(jnp.float32)
        for ddx in (-1, 0, 1):
            mx = ((xx + ddx >= 0) & (xx + ddx < W)).astype(jnp.float32)
            mask_rows.append(jnp.outer(my, mx).reshape(HW))
    masks = jnp.stack(mask_rows)                      # (9, HW)

    # Additive correction = conv of the (interior-only) BN2 shift + conv bias.
    c_tap = jnp.einsum('c,ijck->ijk', shift2, w2).reshape(9, K)
    corr_b = jnp.einsum('tk,ti->ki', c_tap, masks) + b2[:, None]   # (K, HW)

    TC = _pick_c1_chunk(C1, HW, K, y1_esize)
    NC = C1 // TC

    vmem2 = _vmem_limit(2 * (TC * HW * y1_esize + 9 * K * TC * 4
                             + K * HW * 4 + 9 * HW * 4 + K * HW * 4)
                        + 9 * K * HW * 4)

    y2 = pl.pallas_call(
        partial(_stage2_kernel, W),
        out_shape=jax.ShapeDtypeStruct((N, K, HW), jnp.float32),
        grid_spec=pltpu.PrefetchScalarGridSpec(
            num_scalar_prefetch=0,
            grid=(N, NC),
            in_specs=[
                pl.BlockSpec((pl.Squeezed(), TC, HW), lambda n, c: (n, c, 0)),
                pl.BlockSpec((9 * K, TC), lambda n, c: (0, c)),
                pl.BlockSpec((K, HW), lambda n, c: (0, 0)),
                pl.BlockSpec((9, HW), lambda n, c: (0, 0)),
            ],
            out_specs=pl.BlockSpec((pl.Squeezed(), K, HW),
                                   lambda n, c: (n, 0, 0)),
        ),
        compiler_params=pltpu.CompilerParams(
            dimension_semantics=("parallel", "arbitrary"),
            vmem_limit_bytes=vmem2),
    )(y1, w2f, corr_b, masks)

    y2_nchw = y2.reshape(N, K, H, W)        # already NCHW-ordered (lane-dense)
    return jnp.concatenate([x_nchw, y2_nchw], axis=1)


# ---------------------------------------------------------------------------
# Pure-JAX reference (for correctness check only)
# ---------------------------------------------------------------------------
def bottleneck_reference(x_nchw, params):
    g1, be1, w1, b1, g2, be2, w2, b2 = params

    def bn(x, g, b):
        mu = jnp.mean(x, axis=(0, 2, 3), keepdims=True)
        var = jnp.var(x, axis=(0, 2, 3), keepdims=True)
        return ((x - mu) / jnp.sqrt(var + EPS)) * g[None, :, None, None] \
            + b[None, :, None, None]

    w1_oihw = jnp.transpose(w1, (1, 0))[:, :, None, None]     # (C1, Cin, 1, 1)
    h = bn(x_nchw, g1, be1)
    h = jax.lax.conv_general_dilated(h, w1_oihw, (1, 1), 'VALID',
                                     dimension_numbers=('NCHW', 'OIHW', 'NCHW'))
    h = _prelu(h + b1[None, :, None, None])

    w2_oihw = jnp.transpose(w2, (3, 2, 0, 1))                  # (K, C1, 3, 3)
    h2 = bn(h, g2, be2)
    h2 = jax.lax.conv_general_dilated(h2, w2_oihw, (1, 1), ((1, 1), (1, 1)),
                                      dimension_numbers=('NCHW', 'OIHW', 'NCHW'))
    h2 = _prelu(h2 + b2[None, :, None, None])
    return jnp.concatenate([x_nchw, h2], axis=1)


if __name__ == "__main__":
    key = jax.random.PRNGKey(0)
    N, Cin, H, W = 2, 8, 16, 16
    k = 8
    C1 = 4 * k

    ks = jax.random.split(key, 5)
    x = jax.random.normal(ks[0], (N, Cin, H, W), jnp.float32)

    # Deterministic parameter init (matching shapes of the PyTorch module;
    # BN gamma=1 / beta=0 and PReLU a=0.25 are the PyTorch defaults).
    g1 = jnp.ones((Cin,), jnp.float32)
    be1 = jnp.zeros((Cin,), jnp.float32)
    w1 = 0.1 * jax.random.normal(ks[1], (Cin, C1), jnp.float32)      # 1x1 conv
    b1 = 0.1 * jax.random.normal(ks[2], (C1,), jnp.float32)
    g2 = jnp.ones((C1,), jnp.float32)
    be2 = jnp.zeros((C1,), jnp.float32)
    w2 = 0.1 * jax.random.normal(ks[3], (3, 3, C1, k), jnp.float32)  # 3x3 HWIO
    b2 = 0.1 * jax.random.normal(ks[4], (k,), jnp.float32)
    params = (g1, be1, w1, b1, g2, be2, w2, b2)

    out = jax.block_until_ready(bottleneck_forward(x, params))
    ref = jax.block_until_ready(bottleneck_reference(x, params))

    assert out.shape == (N, Cin + k, H, W), out.shape
    np.testing.assert_allclose(np.asarray(out), np.asarray(ref),
                               atol=2e-3, rtol=2e-3)
    print("KERNEL_OK")
</pallas_src>

<mosaic_0001>
module attributes {stable_mosaic.version = 11 : i64} {
  func.func @_stage1_kernel(%arg0: i32, %arg1: i32, %arg2: memref<1x8x256xf32, #tpu.memory_space<vmem>>, %arg3: memref<32x8xf32, #tpu.memory_space<vmem>>, %arg4: memref<32x1xf32, #tpu.memory_space<vmem>>, %arg5: memref<1x32x256xf32, #tpu.memory_space<vmem>>, %arg6: memref<1x32x2xf32, #tpu.memory_space<vmem>>) attributes {dimension_semantics = [#tpu.dimension_semantics<parallel>, #tpu.dimension_semantics<arbitrary>], iteration_bounds = array<i64: 2, 1>, scalar_prefetch = 0 : i64, scratch_operands = 0 : i64, tpu.core_type = #tpu.core_type<tc>, window_params = [{transform_indices = @transform_0, window_bounds = array<i64: 1, 8, 256>}, {pipeline_mode = #tpu.pipeline_mode<synchronous>, transform_indices = @transform_1, window_bounds = array<i64: 32, 8>}, {pipeline_mode = #tpu.pipeline_mode<synchronous>, transform_indices = @transform_2, window_bounds = array<i64: 32, 1>}, {transform_indices = @transform_3, window_bounds = array<i64: 1, 32, 256>}, {transform_indices = @transform_4, window_bounds = array<i64: 1, 32, 2>}]} {
    %c0 = arith.constant 0 : index
    %c0_0 = arith.constant 0 : index
    %0 = vector.load %arg3[%c0, %c0_0] : memref<32x8xf32, #tpu.memory_space<vmem>>, vector<32x8xf32>
    %c0_1 = arith.constant 0 : index
    %c0_2 = arith.constant 0 : index
    %c0_3 = arith.constant 0 : index
    %1 = vector.load %arg2[%c0_1, %c0_2, %c0_3] : memref<1x8x256xf32, #tpu.memory_space<vmem>>, vector<1x8x256xf32>
    %2 = vector.shape_cast %1 : vector<1x8x256xf32> to vector<8x256xf32>
    %cst = arith.constant dense<0.000000e+00> : vector<32x256xf32>
    %3 = tpu.matmul %0, %2, %cst {dimension_numbers = #tpu.dot_dimension_numbers<[1], [0], [0], [1], [0, 0, 1, 1], [], []>} : vector<32x8xf32>, vector<8x256xf32>, vector<32x256xf32> -> vector<32x256xf32>
    %c0_4 = arith.constant 0 : index
    %c0_5 = arith.constant 0 : index
    %4 = vector.load %arg4[%c0_4, %c0_5] : memref<32x1xf32, #tpu.memory_space<vmem>>, vector<32x1xf32>
    %5 = vector.broadcast %4 : vector<32x1xf32> to vector<32x256xf32>
    %6 = arith.addf %3, %5 : vector<32x256xf32>
    %cst_6 = arith.constant 0.000000e+00 : f32
    %7 = vector.broadcast %cst_6 : f32 to vector<32x256xf32>
    %8 = arith.cmpf oge, %6, %7 : vector<32x256xf32>
    %cst_7 = arith.constant 2.500000e-01 : f32
    %9 = vector.broadcast %cst_7 : f32 to vector<32x256xf32>
    %10 = arith.mulf %9, %6 : vector<32x256xf32>
    %11 = arith.select %8, %6, %10 : vector<32x256xi1>, vector<32x256xf32>
    %c0_8 = arith.constant 0 : index
    %c0_9 = arith.constant 0 : index
    %c0_10 = arith.constant 0 : index
    %12 = vector.load %arg5[%c0_8, %c0_9, %c0_10] : memref<1x32x256xf32, #tpu.memory_space<vmem>>, vector<1x32x256xf32>
    %13 = vector.shape_cast %12 : vector<1x32x256xf32> to vector<32x256xf32>
    %14 = vector.shape_cast %11 : vector<32x256xf32> to vector<1x32x256xf32>
    tpu.vector_store %arg5[%c0_8, %c0_9, %c0_10], %14 {strides = array<i32>} : memref<1x32x256xf32, #tpu.memory_space<vmem>>, vector<1x32x256xf32>,
    %c0_i32 = arith.constant 0 : i32
    %15 = arith.cmpi eq, %arg1, %c0_i32 : i32
    %16 = arith.extui %15 : i1 to i32
    %c0_i32_11 = arith.constant 0 : i32
    %17 = arith.cmpi ne, %16, %c0_i32_11 : i32
    scf.if %17 {
      %cst_25 = arith.constant 0.000000e+00 : f32
      %35 = vector.broadcast %cst_25 : f32 to vector<32x2xf32>
      %c0_26 = arith.constant 0 : index
      %c0_27 = arith.constant 0 : index
      %c0_28 = arith.constant 0 : index
      %36 = vector.load %arg6[%c0_26, %c0_27, %c0_28] : memref<1x32x2xf32, #tpu.memory_space<vmem>>, vector<1x32x2xf32>
      %37 = vector.shape_cast %36 : vector<1x32x2xf32> to vector<32x2xf32>
      %38 = vector.shape_cast %35 : vector<32x2xf32> to vector<1x32x2xf32>
      tpu.vector_store %arg6[%c0_26, %c0_27, %c0_28], %38 {strides = array<i32>} : memref<1x32x2xf32, #tpu.memory_space<vmem>>, vector<1x32x2xf32>,
    } else {
    }
    %c0_12 = arith.constant 0 : index
    %c0_13 = arith.constant 0 : index
    %c0_14 = arith.constant 0 : index
    %18 = vector.load %arg6[%c0_12, %c0_13, %c0_14] : memref<1x32x2xf32, #tpu.memory_space<vmem>>, vector<1x32x1xf32>
    %19 = vector.shape_cast %18 : vector<1x32x1xf32> to vector<32x1xf32>
    %cst_15 = arith.constant dense<0.000000e+00> : vector<32xf32>
    %20 = vector.multi_reduction <add>, %11, %cst_15 [1] : vector<32x256xf32> to vector<32xf32>
    %21 = vector.shape_cast %20 : vector<32xf32> to vector<32x1xf32>
    %22 = arith.addf %19, %21 : vector<32x1xf32>
    %c0_16 = arith.constant 0 : index
    %c0_17 = arith.constant 0 : index
    %c0_18 = arith.constant 0 : index
    %23 = vector.load %arg6[%c0_16, %c0_17, %c0_18] : memref<1x32x2xf32, #tpu.memory_space<vmem>>, vector<1x32x1xf32>
    %24 = vector.shape_cast %23 : vector<1x32x1xf32> to vector<32x1xf32>
    %25 = vector.shape_cast %22 : vector<32x1xf32> to vector<1x32x1xf32>
    tpu.vector_store %arg6[%c0_16, %c0_17, %c0_18], %25 {strides = array<i32>} : memref<1x32x2xf32, #tpu.memory_space<vmem>>, vector<1x32x1xf32>,
    %c0_19 = arith.constant 0 : index
    %c0_20 = arith.constant 0 : index
    %c1 = arith.constant 1 : index
    %26 = vector.load %arg6[%c0_19, %c0_20, %c1] : memref<1x32x2xf32, #tpu.memory_space<vmem>>, vector<1x32x1xf32>
    %27 = vector.shape_cast %26 : vector<1x32x1xf32> to vector<32x1xf32>
    %28 = arith.mulf %11, %11 : vector<32x256xf32>
    %cst_21 = arith.constant dense<0.000000e+00> : vector<32xf32>
    %29 = vector.multi_reduction <add>, %28, %cst_21 [1] : vector<32x256xf32> to vector<32xf32>
    %30 = vector.shape_cast %29 : vector<32xf32> to vector<32x1xf32>
    %31 = arith.addf %27, %30 : vector<32x1xf32>
    %c0_22 = arith.constant 0 : index
    %c0_23 = arith.constant 0 : index
    %c1_24 = arith.constant 1 : index
    %32 = vector.load %arg6[%c0_22, %c0_23, %c1_24] : memref<1x32x2xf32, #tpu.memory_space<vmem>>, vector<1x32x1xf32>
    %33 = vector.shape_cast %32 : vector<1x32x1xf32> to vector<32x1xf32>
    %34 = vector.shape_cast %31 : vector<32x1xf32> to vector<1x32x1xf32>
    tpu.vector_store %arg6[%c0_22, %c0_23, %c1_24], %34 {strides = array<i32>} : memref<1x32x2xf32, #tpu.memory_space<vmem>>, vector<1x32x1xf32>,
    return
  }
  func.func @transform_0(%arg0: i32, %arg1: i32) -> (i32, i32, i32) {
    %c0_i32 = arith.constant 0 : i32
    %c0_i32_0 = arith.constant 0 : i32
    return %arg0, %c0_i32, %arg1 : i32, i32, i32
  }
  func.func @transform_1(%arg0: i32, %arg1: i32) -> (i32, i32) {
    %c0_i32 = arith.constant 0 : i32
    %c0_i32_0 = arith.constant 0 : i32
    %c0_i32_1 = arith.constant 0 : i32
    return %c0_i32, %c0_i32_0 : i32, i32
  }
  func.func @transform_2(%arg0: i32, %arg1: i32) -> (i32, i32) {
    %c0_i32 = arith.constant 0 : i32
    %c0_i32_0 = arith.constant 0 : i32
    %c0_i32_1 = arith.constant 0 : i32
    return %c0_i32, %c0_i32_0 : i32, i32
  }
  func.func @transform_3(%arg0: i32, %arg1: i32) -> (i32, i32, i32) {
    %c0_i32 = arith.constant 0 : i32
    %c0_i32_0 = arith.constant 0 : i32
    return %arg0, %c0_i32, %arg1 : i32, i32, i32
  }
  func.func @transform_4(%arg0: i32, %arg1: i32) -> (i32, i32, i32) {
    %c0_i32 = arith.constant 0 : i32
    %c0_i32_0 = arith.constant 0 : i32
    %c0_i32_1 = arith.constant 0 : i32
    return %arg0, %c0_i32, %c0_i32_0 : i32, i32, i32
  }
}

</mosaic_0001>

<bundles_post_ra>
// kernel: tpu_custom_call.1
= control target key start
LH: loop header
LB: loop body
LE: loop exit
PB: predicated region body
PF: predicated region fallthrough
CT: control target
= control target key end

     0   :  { %10 = vsyncpa [#allocation3], 0  ;;  %s989_s0 = inlined_call_operand.vmem [shape: f32[2,8,256], index: 0, kind: input, shape index: {}]   ;;  %s990_s1 = inlined_call_operand.vmem [shape: f32[32,8], index: 1, kind: input, shape index: {}]   ;;  %s991_s2 = inlined_call_operand.vmem [shape: f32[32,1], index: 2, kind: input, shape index: {}]   ;;  %s992_s3 = inlined_call_operand.hbm [shape: f32[2,32,256], index: 3, kind: output, shape index: {0}]   ;;  %s993_s4 = inlined_call_operand.vmem [shape: f32[2,32,2], index: 4, kind: output, shape index: {1}]  }
   0x1   :  { %12 = vsyncpa [#allocation3 + $0x1], 0  ;;  %s794_s15 = smov 0   ;;  %s796_s16 = smov 0  }
   0x2   :  { %s798_s17 = smov 0   ;;  %s800_s18 = smov 0  }
   0x3   :  { %s802_s19 = smov 0   ;;  %s804_s20 = smov 0  }
   0x4 LB: > { %s599_s21 = sadd.s32 4294967295, %s762_s20   ;;  %s600_s22 = sadd.s32 4294967294, %s762_s20   ;;  %s762_s20 = sphi %s804_s20, %s18_s20   ;;  %s758_s19 = sphi %s802_s19, %s1000_s19   ;;  %s754_s18 = sphi %s800_s18, %s999_s18   ;;  %s750_s17 = sphi %s798_s17, %s998_s17   ;;  %s746_s16 = sphi %s796_s16, %s997_s16   ;;  %s742_s15 = sphi %s794_s15, %s996_s15  }
   0x5   : > { %s30_s23 = sadd.s32 1, %s758_s19  ;;  %s109_s24 = sadd.s32 1, %s750_s17 }
   0x6   : > { %p32_p0 = scmp.ge.s32.totalorder %s30_s23, 2  ;;  %p119_p1 = scmp.ne.s32.totalorder %s750_s17, %s746_s16 }
   0x7   : > { %p120_p2 = scmp.eq.s32.totalorder %s599_s21, 1  ;;  %p125_p3 = scmp.ne.s32.totalorder %s746_s16, %s742_s15 }
   0x8   : > { %s1002_s23 = smov (%p32_p0, %s30_s23), 0  ;;  %p126_p5 = scmp.eq.s32.totalorder %s600_s22, 1 }
   0x9   : > { %p834_p4 = por %p120_p2, %p119_p1  ;;  %s104_s26 = ssub.s32 %s758_s19, %s1002_s23 }
   0xa   : > { %p603_p6 = scmp.ge.s32.totalorder %s762_s20, 1  ;;  %p107_p7 = scmp.eq.s32.totalorder %s104_s26, 0 }
   0xb   : > { %p841_p8 = por %p126_p5, %p125_p3  ;;  %p189_p9 = scmp.lt.s32.totalorder %s762_s20, 3 }
   0xc   : > { %s847_s28 = scalar_select %p107_p7, %s750_s17, %s109_s24  }
   0xd   : > { %p190_p10 = pnand %p603_p6, %p189_p9 }
   0xe   : > { %p225_p11 = scmp.lt.s32.totalorder (!%p190_p10), %s754_s18, 1  ;;  %v764_v0 = vmov (!%p190_p10), 0.0   ;;  %v246_v1 = vld [vmem:[%s991_s2] sm:$0xff] (!%p190_p10)  ;;  %v248_v2 = vld [vmem:[%s991_s2 + $0x10] sm:$0xff] (!%p190_p10)  ;;  %v765_v3 = vmov (!%p190_p10), 0   ;;  %vm270_vm0 = vcmask (!%p190_p10), 64512  }
   0xf   : > { %193 = sbr.rel (%p190_p10) target bundleno = 414 (0x19e), region = 32  ;;  %347 = vmatprep.mubr.f32.mxu0 (!%p190_p10), %v764_v0  ;;  %359 = vmatprep.mubr.f32.mxu1 (!%p190_p10), %v764_v0  ;;  %v240_v4 = vld [vmem:[%s990_s1] sm:$0xff] (!%p190_p10)  ;;  %v242_v7 = vld [vmem:[%s990_s1 + $0x10] sm:$0xff] (!%p190_p10)  ;;  %v247_v8 = vld [vmem:[%s991_s2 + $0x8] sm:$0xff] (!%p190_p10)  ;;  %vm408_vm1 = vcmask (!%p190_p10), 15360   ;;  %s214_s13 = sand.u32 (!%p190_p10), 1, %s746_s16  }
  0x10   : > { %682 = vset.pattern.permute.xlu0 (!%p190_p10), %v765_v3  ;;  %683 = vset.pattern.permute.xlu1 (!%p190_p10), %v765_v3  ;;  %v249_v9 = vld [vmem:[%s991_s2 + $0x18] sm:$0xff] (!%p190_p10)  ;;  %v241_v10 = vld [vmem:[%s990_s1 + $0x8] sm:$0xff] (!%p190_p10)  ;;  %s620_s21 = sshll.u32 (!%p190_p10), %s754_s18, 10  ;;  %s919_s30 = scalar_lea.sflag (!%p190_p10), [#allocation3], %s214_s13 }
  0x11   : > { %252 = vperm.xlu0 (!%p190_p10), %682, %v246_v1   ;;  %262 = vperm.xlu1 (!%p190_p10), %683, %v248_v2   ;;  %v243_v11 = vld [vmem:[%s990_s1 + $0x18] sm:$0xff] (!%p190_p10)  ;;  %s913_s29 = scalar_lea.hbm (!%p190_p10), %s992_s3, %s620_s21 }
  0x15   : > { %257 = vperm.xlu0 (!%p190_p10), %682, %v247_v8   ;;  %267 = vperm.xlu1 (!%p190_p10), %683, %v249_v9  }
  0x16   : > { %s857_s7 = scalar_select %p225_p11, %s754_s18, 1 }
  0x17   : > { %s766_s18 = smov [#allocation2]  }
  0x18   : > { %s618_s8 = sshll.u32 %s857_s7, 4  ;;  %s619_s9 = sshll.u32 %s857_s7, 5 }
  0x19   : > { %s232_s11 = scalar_lea.vmem %s989_s0, %s618_s8  ;;  %s889_s12 = scalar_lea.vmem %s993_s4, %s619_s9 }
  0x1a   : > { %v245_v5 = vld [vmem:[%s232_s11 + $0x8] sm:$0xff]  ;;  %v244_v6 = vld [vmem:[%s232_s11] sm:$0xff]  ;;  %409 = vst.msk [vmem:[%s889_s12] sm:$0xff] %vm408_vm1, %v764_v0  ;;  %410 = vst.msk [vmem:[%s889_s12 + $0x8] sm:$0xff] %vm408_vm1, %v764_v0  ;;  %s604_s7 = sshll.u32 %s214_s13, 6  ;;  %s688_s6 = sshll.u32 %s766_s18, 4  ;;  %s689_s6 = int_to_ptr.vmem [resolvable:$false] %s688_s6 }
  0x1b   : > { %283 = vmatprep.subr.mxu0 %v245_v5  ;;  %621 = vmatprep.subr.mxu1 %v245_v5  ;;  %411 = vst.msk [vmem:[%s889_s12 + $0x10] sm:$0xff] %vm408_vm1, %v764_v0  ;;  %412 = vst.msk [vmem:[%s889_s12 + $0x18] sm:$0xff] %vm408_vm1, %v764_v0  ;;  %s898_s14 = scalar_lea.vmem [#allocation2], %s604_s7  ;;  %s690_s8 = scalar_lea.vmem %s689_s6, 2048 }
  0x1c   : > { %284 = vmatpush1.msra.mxu0 %v244_v6  ;;  %622 = vmatpush1.msra.mxu1 %v244_v6  ;;  %s492_s22 = sshll.u32 %s898_s14, 4  ;;  %s915_s22 = int_to_ptr.vmem [resolvable:$true] %s492_s22 }
  0x1d   : > { %609 = vmatmul.mubr.msk.f32.vlgmr.msra.gmra.mrb[0].mxu0 %vm270_vm0, %v240_v4  ;;  %611 = vmatmul.mubr.msk.f32.vlgmr.msra.gmra.mrb[0].mxu1 %vm270_vm0, %v242_v7  ;;  %s684_s5 = scalar_lea.vmem %s915_s22, 1024  ;;  %p691_p1 = scmp.lt.s32.totalorder %s915_s22, %s689_s6 }
  0x1e   : > { %353 = vmatprep.mubr.f32.mxu0 %v764_v0  ;;  %365 = vmatprep.mubr.f32.mxu1 %v764_v0  ;;  %p685_p12 = scmp.ne.s32.totalorder %s915_s22, %s684_s5  ;;  %p692_p2 = scmp.lt.s32.totalorder %s690_s8, %s684_s5 }
  0x20   : > { %p686_p13 = pnand %p685_p12, %p834_p4  ;;  %p693_p3 = por %p692_p2, %p691_p1 }
  0x21   : > { %610 = vmatmul.mubr.msk.f32.gmra.mrb[2].mxu0 %vm270_vm0, %v241_v10  ;;  %612 = vmatmul.mubr.msk.f32.gmra.mrb[2].mxu1 %vm270_vm0, %v243_v11 }
  0x22   : > { %p687_p0 = pneg %p686_p13 }
  0x24   : > { %p694_p5 = pnand %p693_p3, %p687_p0 }
  0x90   : > { %v263_v12 = vpop.permute.xlu1 %262  ;;  %v253_v13 = vpop.permute.xlu0 %252 }
  0x94   : > { %v268_v22 = vpop.permute.xlu1 %267  ;;  %v258_v24 = vpop.permute.xlu0 %257 }
  0xf0   : > { %v349_v14 = vpop.f32.mrb[0].mxu0  ;;  %v361_v15 = vpop.f32.mrb[0].mxu1 }
  0xf1   : > { %v350_v16 = vadd.f32 %v349_v14, %v253_v13  ;;  %v351_v17 = vpop.f32.mrb[1].mxu0  ;;  %v362_v18 = vadd.f32 %v361_v15, %v263_v12  ;;  %v363_v19 = vpop.f32.mrb[1].mxu1 }
  0xf2   : > { %v352_v20 = vadd.f32 %v351_v17, %v253_v13  ;;  %v364_v21 = vadd.f32 %v363_v19, %v263_v12 }
  0xf3   : > { %vm372_vm2 = vcmp.ge.f32.partialorder %v350_v16, 0.0  ;;  %v380_v23 = vmul.f32 0.25, %v350_v16  ;;  %vm376_vm3 = vcmp.ge.f32.partialorder %v362_v18, 0.0  ;;  %v384_v25 = vmul.f32 0.25, %v362_v18 }
  0xf4   : > { %vm373_vm4 = vcmp.ge.f32.partialorder %v352_v20, 0.0  ;;  %v381_v26 = vmul.f32 0.25, %v352_v20  ;;  %vm377_vm5 = vcmp.ge.f32.partialorder %v364_v21, 0.0  ;;  %v385_v27 = vmul.f32 0.25, %v364_v21  ;;  %v355_v28 = vpop.f32.mrb[2].mxu0  ;;  %v367_v29 = vpop.f32.mrb[2].mxu1 }
  0xf5   : > { %v356_v30 = vadd.f32 %v355_v28, %v258_v24  ;;  %v368_v31 = vadd.f32 %v367_v29, %v268_v22  ;;  %v357_v32 = vpop.f32.mrb[3].mxu0  ;;  %v369_v33 = vpop.f32.mrb[3].mxu1  ;;  %v388_v34 = vsel %vm372_vm2, %v350_v16, %v380_v23  ;;  %v392_v35 = vsel %vm376_vm3, %v362_v18, %v384_v25 }
  0xf6   : > { %v358_v36 = vadd.f32 %v357_v32, %v258_v24  ;;  %v370_v37 = vadd.f32 %v369_v33, %v268_v22  ;;  %v389_v38 = vsel %vm373_vm4, %v352_v20, %v381_v26  ;;  %396 = vst [vmem:[%s898_s14] sm:$0xff] %v388_v34  ;;  %v393_v39 = vsel %vm377_vm5, %v364_v21, %v385_v27 }
  0xf7   : > { %400 = vst [vmem:[%s898_s14 + $0x20] sm:$0xff] %v392_v35  ;;  %vm374_vm6 = vcmp.ge.f32.partialorder %v356_v30, 0.0  ;;  %v382_v40 = vmul.f32 0.25, %v356_v30  ;;  %vm378_vm7 = vcmp.ge.f32.partialorder %v368_v31, 0.0  ;;  %v386_v41 = vmul.f32 0.25, %v368_v31  ;;  %397 = vst [vmem:[%s898_s14 + $0x8] sm:$0xff] %v389_v38 }
  0xf8   : > { %401 = vst [vmem:[%s898_s14 + $0x28] sm:$0xff] %v393_v39  ;;  %vm375_vm8 = vcmp.ge.f32.partialorder %v358_v36, 0.0  ;;  %v383_v42 = vmul.f32 0.25, %v358_v36  ;;  %vm379_vm9 = vcmp.ge.f32.partialorder %v370_v37, 0.0  ;;  %v387_v43 = vmul.f32 0.25, %v370_v37 }
  0xf9   : > { %v417_v44 = vadd.f32 %v389_v38, %v388_v34  ;;  %v390_v45 = vsel %vm374_vm6, %v356_v30, %v382_v40  ;;  %v423_v46 = vadd.f32 %v393_v39, %v392_v35  ;;  %v442_v47 = vmul.f32 %v388_v34, %v388_v34 }
  0xfa   : > { %v391_v48 = vsel %vm375_vm8, %v358_v36, %v383_v42  ;;  %398 = vst [vmem:[%s898_s14 + $0x10] sm:$0xff] %v390_v45  ;;  %v443_v49 = vmul.f32 %v389_v38, %v389_v38  ;;  %v394_v50 = vsel %vm378_vm7, %v368_v31, %v386_v41  ;;  %v395_v51 = vsel %vm379_vm9, %v370_v37, %v387_v43 }
  0xfb   : > { %418 = vadd.xlane.f32.xlu0 %v417_v44  ;;  %v420_v52 = vadd.f32 %v391_v48, %v390_v45  ;;  %399 = vst [vmem:[%s898_s14 + $0x18] sm:$0xff] %v391_v48  ;;  %v426_v53 = vadd.f32 %v395_v51, %v394_v50  ;;  %402 = vst [vmem:[%s898_s14 + $0x30] sm:$0xff] %v394_v50  ;;  %v446_v54 = vmul.f32 %v392_v35, %v392_v35 }
  0xfc   : > { %403 = vst [vmem:[%s898_s14 + $0x38] sm:$0xff] %v395_v51  ;;  %v447_v55 = vmul.f32 %v393_v39, %v393_v39  ;;  %v450_v56 = vadd.f32 %v443_v49, %v442_v47  ;;  %v444_v57 = vmul.f32 %v390_v45, %v390_v45  ;;  %v445_v58 = vmul.f32 %v391_v48, %v391_v48 }
  0xfd   : > { %v448_v59 = vmul.f32 %v394_v50, %v394_v50  ;;  %421 = vadd.xlane.f32.xlu1 %v420_v52  ;;  %v449_v61 = vmul.f32 %v395_v51, %v395_v51 }
  0xfe   : > { %v456_v60 = vadd.f32 %v447_v55, %v446_v54  ;;  %v453_v62 = vadd.f32 %v445_v58, %v444_v57 }
  0xff   : > { %424 = vadd.xlane.f32.xlu0 %v423_v46  ;;  %v459_v63 = vadd.f32 %v449_v61, %v448_v59 }
 0x101   : > { %451 = vadd.xlane.f32.xlu1 %v450_v56 }
 0x103   : > { %427 = vadd.xlane.f32.xlu0 %v426_v53 }
 0x105   : > { %457 = vadd.xlane.f32.xlu1 %v456_v60 }
 0x107   : > { %454 = vadd.xlane.f32.xlu0 %v453_v62 }
 0x10b   : > { %460 = vadd.xlane.f32.xlu0 %v459_v63 }
 0x10c   : > { %697 = shalt.err (!%p694_p5)
}
 0x10d   : > { %s698_s9 = scalar_lea.hbm %s913_s29, 1024  ;;  %s702_s13 = scalar_lea.hbm %s992_s3, 2048 }
 0x10e   : > { %p699_p6 = scmp.ne.s32.totalorder %s913_s29, %s698_s9  ;;  %p703_p10 = scmp.lt.u32.totalorder %s913_s29, %s992_s3 }
 0x10f   : > { %p704_p11 = scmp.lt.u32.totalorder %s702_s13, %s698_s9  ;;  %p706_p13 = scmp.lt.u32.totalorder %s698_s9, %s913_s29 }
 0x110   : > { %p700_p7 = pnand %p699_p6, %p834_p4 }
 0x111   : > { %p705_p12 = por %p704_p11, %p703_p10 }
 0x112   : > { %p701_p9 = pneg %p700_p7 }
 0x113   : > { %p707_p0 = por %p706_p13, %p705_p12 }
 0x115   : > { %p708_p1 = pnand %p707_p0, %p701_p9 }
 0x117   : > { %711 = shalt.err (!%p708_p1)
}
 0x118   : > { %s767_s21 = smov 256   ;;  %s768_s24 = smov 16   ;;  %v413_v0 = vld [vmem:[%s889_s12] sm:$0xff]  ;;  %vm433_vm10 = vcmask 7168   ;;  %v414_v2 = vld [vmem:[%s889_s12 + $0x8] sm:$0xff]  ;;  %v415_v5 = vld [vmem:[%s889_s12 + $0x10] sm:$0xff] }
 0x119   : > { %623 = dma.vmem_to_hbm [thread:$0]  (%p834_p4), %s915_s22, 1024, %s913_s29, %s919_s30, %s767_s21, %s767_s21, %s768_s24   ;;  %vm466_vm11 = vcmask 15368  }
 0x11a   : > { %v416_v9 = vld [vmem:[%s889_s12 + $0x18] sm:$0xff] }
 0x188   : > { %v419_v1 = vpop.xlane.xlu0 %418 }
 0x189   : > { %v429_v3 = vadd.f32 %v419_v1, %v413_v0 }
 0x18a   : > { %v422_v4 = vpop.xlane.xlu1 %421 }
 0x18b   : > { %434 = vst.msk [vmem:[%s889_s12] sm:$0xff] %vm433_vm10, %v429_v3  ;;  %v430_v6 = vadd.f32 %v422_v4, %v414_v2 }
 0x18c   : > { %v425_v7 = vpop.xlane.xlu0 %424 }
 0x18d   : > { %435 = vst.msk [vmem:[%s889_s12 + $0x8] sm:$0xff] %vm433_vm10, %v430_v6  ;;  %v431_v8 = vadd.f32 %v425_v7, %v415_v5 }
 0x18e   : > { %v452_v10 = vpop.xlane.xlu1 %451 }
 0x18f   : > { %436 = vst.msk [vmem:[%s889_s12 + $0x10] sm:$0xff] %vm433_vm10, %v431_v8 }
 0x190   : > { %v428_v11 = vpop.xlane.xlu0 %427 }
 0x191   : > { %v432_v12 = vadd.f32 %v428_v11, %v416_v9 }
 0x192   : > { %v438_v13 = vld [vmem:[%s889_s12] sm:$0xff]  ;;  %v458_v18 = vpop.xlane.xlu1 %457 }
 0x193   : > { %v462_v14 = vadd.f32 %v452_v10, %v438_v13  ;;  %437 = vst.msk [vmem:[%s889_s12 + $0x18] sm:$0xff] %vm433_vm10, %v432_v12 }
 0x194   : > { %v439_v15 = vld [vmem:[%s889_s12 + $0x8] sm:$0xff]  ;;  %v455_v16 = vpop.xlane.xlu0 %454 }
 0x195   : > { %467 = vst.msk [vmem:[%s889_s12] sm:$0xff] %vm466_vm11, %v462_v14  ;;  %v463_v17 = vadd.f32 %v455_v16, %v439_v15 }
 0x196   : > { %v440_v19 = vld [vmem:[%s889_s12 + $0x10] sm:$0xff] }
 0x197   : > { %v464_v20 = vadd.f32 %v458_v18, %v440_v19  ;;  %468 = vst.msk [vmem:[%s889_s12 + $0x8] sm:$0xff] %vm466_vm11, %v463_v17 }
 0x198   : > { %v461_v22 = vpop.xlane.xlu0 %460 }
 0x199   : > { %469 = vst.msk [vmem:[%s889_s12 + $0x10] sm:$0xff] %vm466_vm11, %v464_v20 }
 0x19a   : > { %v441_v21 = vld [vmem:[%s889_s12 + $0x18] sm:$0xff] }
 0x19b   : > { %v465_v23 = vadd.f32 %v461_v22, %v441_v21 }
 0x19d   : > { %470 = vst.msk [vmem:[%s889_s12 + $0x18] sm:$0xff] %vm466_vm11, %v465_v23 }
 0x19e PF: > { %p629_p4 = scmp.ge.s32.totalorder %s762_s20, 2  ;;  %s510_s25 = sand.u32 1, %s742_s15  }
 0x19f   : > { %s511_s22 = scalar_lea.sflag [#allocation3], %s510_s25 }
 0x1a0   : > { %p626_p2 = pnand %p629_p4, %p841_p8 }
 0x1a2   : > { %737 = dma.done.wait (!%p626_p2), %s511_s22, 1024  }
 0x1a3   : > { %739 = vsyncadd (!%p626_p2), %s511_s22, 4294966272  ;;  %s18_s20 = sadd.s32 1, %s762_s20   ;;  %s996_s15 = smov %s746_s16 }
 0x1a4   : > { %p15_p3 = scmp.ge.s32.totalorder %s18_s20, 4   ;;  %s997_s16 = smov %s750_s17 }
 0x1a5   : > { %s998_s17 = smov %s847_s28  ;;  %s999_s18 = smov %s758_s19 }
 0x1a6   : > { %s1000_s19 = smov %s1002_s23  ;;  %17 = sbr.rel (!%p15_p3) target bundleno = 4 (0x4), region = 83 }
 0x1ad   :  { %524 = vsyncpa [#allocation3], 1 }
 0x1ae   :  { %526 = vsyncpa [#allocation3 + $0x1], 1 }

</bundles_post_ra>
